<compile_context>
chip_gen: v7x
topology: tpu7x:2x2x1
jax: 0.10.0
libtpu: 0.0.40
codegen_flags: <defaults>
</compile_context>

<pallas_src>
import jax
import jax.numpy as jnp
from jax.experimental import pallas as pl
from jax.experimental.pallas import tpu as pltpu


def _round_up(x, m):
    return (x + m - 1) // m * m


def _cdiv(a, b):
    return -(-a // b)


def _pad2(a, rows, cols):
    r, c = a.shape
    if r == rows and c == cols:
        return a
    return jnp.pad(a, ((0, rows - r), (0, cols - c)))


def _vmem_capacity_bytes():
    """Physical VMEM per core; conservative (v7x-safe) fallback if the query fails."""
    try:
        cap = getattr(pltpu.get_tpu_info(), "vmem_capacity_bytes", None)
        if cap:
            return int(cap)
    except Exception:
        pass
    return 64 * 1024 * 1024


# Errors worth retrying the resident build without pl.Buffered(1); genuine user errors
# (shape bugs, bad dtypes in our own code) are NOT masked by this list.
_RETRY_ERRORS = (TypeError, ValueError, NotImplementedError, pltpu.LoweringException)
try:
    _RETRY_ERRORS = _RETRY_ERRORS + (jax.errors.JaxRuntimeError,)
except AttributeError:
    pass


# --------------------------------------------------------------------------- kernels
def _ae_kernel_resident(x_ref, w1_ref, b1_ref, w2_ref, b2_ref, o_ref):
    """Full encoder+decoder for one batch tile; W1/W2 fully VMEM-resident."""
    x = x_ref[...].astype(w1_ref.dtype)                     # in-kernel cast (VPU), bf16 MXU inputs
    h = jnp.dot(x, w1_ref[...], preferred_element_type=jnp.float32)
    h = jax.nn.sigmoid(h + b1_ref[...])                     # bias-add + sigmoid in f32 (EUP)
    y = jnp.dot(h.astype(w2_ref.dtype), w2_ref[...],
                preferred_element_type=jnp.float32)
    o_ref[...] = (y + b2_ref[...]).astype(o_ref.dtype)


def _ae_kernel_etiled(x_ref, w1_ref, b1_ref, w2_ref, b2_ref, o_ref, acc_ref):
    """Encoding-dim-tiled variant: grid=(batch tiles, E tiles); decoder accumulated in f32.

    Correctness of E-padding: padded W1 columns / b1 entries are zero, so the padded
    hidden units are sigmoid(0)=0.5, but the matching (zero-padded) W2 rows kill their
    contribution to the accumulator.
    """
    k = pl.program_id(1)

    @pl.when(k == 0)
    def _():
        acc_ref[...] = jnp.zeros_like(acc_ref)

    x = x_ref[...].astype(w1_ref.dtype)
    h = jnp.dot(x, w1_ref[...], preferred_element_type=jnp.float32)
    h = jax.nn.sigmoid(h + b1_ref[...])
    acc_ref[...] += jnp.dot(h.astype(w2_ref.dtype), w2_ref[...],
                            preferred_element_type=jnp.float32)

    @pl.when(k == pl.num_programs(1) - 1)
    def _():
        o_ref[...] = (acc_ref[...] + b2_ref[...]).astype(o_ref.dtype)


# --------------------------------------------------------------------------- wrapper
def linear_autoencoder(x, w1, b1, w2, b2, *, tile_b=None, tile_e=None,
                       compute_dtype=jnp.bfloat16, force_etiled=False):
    """Forward pass of LinearAutoencoder: sigmoid(x @ W1 + b1) @ W2 + b2.

    x : (B, input_dim); w1: (input_dim, encoding_dim); b1: (encoding_dim,) or (1, E);
    w2: (encoding_dim, input_dim); b2: (input_dim,) or (1, D).
    Weights are stored pre-transposed to (in, out).  Returns (B, input_dim) in x.dtype.
    """
    B, D = x.shape
    E = w1.shape[1]
    out_dtype = x.dtype

    Dp = _round_up(D, 128)   # lane-dense feature dims: full-width MXU, unmasked vst
    Ep = _round_up(E, 128)

    xbytes = jnp.dtype(x.dtype).itemsize
    cbytes = jnp.dtype(compute_dtype).itemsize
    obytes = jnp.dtype(out_dtype).itemsize

    # ---- generation-aware VMEM budgets ------------------------------------------
    vmem_cap = _vmem_capacity_bytes()            # 64 MiB on v7x, 128 MiB on v5e/v6e
    budget = (vmem_cap * 3) // 4                 # working-set budget used for tiling
    hard_cap = vmem_cap - 8 * 1024 * 1024        # never request more than physical VMEM

    def vmem_need_resident(t):
        io = 2 * t * Dp * (xbytes + obytes)              # double-buffered x / out tiles
        wts = 2 * Dp * Ep * cbytes                       # W1 + W2 resident (single-buffered)
        bias = (Ep + Dp) * 4
        scratch = t * (Ep * (4 + cbytes) + Dp * (4 + cbytes))  # f32 h/y + bf16 casts
        return io + wts + bias + scratch

    def vmem_need_etiled(t, te):
        io = 2 * t * Dp * (xbytes + obytes)
        wts = 2 * 2 * Dp * te * cbytes                   # W1/W2 tiles, double-buffered
        acc = t * Dp * 4                                 # f32 accumulator scratch
        bias = 2 * te * 4 + Dp * 4
        scratch = t * (te * (4 + cbytes) + Dp * cbytes)
        return io + wts + acc + bias + scratch

    # ---- batch tile: big (fewer grid steps, better DMA efficiency), low padding
    #      waste, >=2 tiles when B is large so v7x can shard over its 2 TCs ---------
    if tile_b is None:
        target = 512
        k = _cdiv(B, target)
        if k == 1 and B >= 128:
            k = 2
        tile_b = min(1024, _round_up(_cdiv(B, k), 8))
    tile_b = max(8, _round_up(tile_b, 8))        # x stays f32 in VMEM -> 8-row sublanes

    resident = (not force_etiled) and \
        (2 * Dp * Ep * cbytes + (Ep + Dp) * 4 <= budget // 2)
    if resident:
        while tile_b > 8 and vmem_need_resident(tile_b) > budget:
            tile_b = _round_up(tile_b // 2, 8)
        if vmem_need_resident(tile_b) > budget:
            resident = False                     # weights too large -> E-tiled fallback

    if not resident:
        if tile_e is None:
            tile_e = min(Ep, 512)
        tile_e = min(max(128, _round_up(tile_e, 128)), Ep)
        while vmem_need_etiled(tile_b, tile_e) > budget and (tile_e > 128 or tile_b > 8):
            if tile_e > 128:
                tile_e = _round_up(tile_e // 2, 128)
            else:
                tile_b = _round_up(tile_b // 2, 8)
        Ep = _round_up(Ep, tile_e)               # grid E axis must divide evenly

    Bp = _round_up(B, tile_b)
    need_pad = (Bp != B) or (Dp != D)

    # ---- operands: x at native dtype (cast in-kernel); weights bf16; biases f32 ---
    xin = _pad2(x, Bp, Dp) if need_pad else x
    w1p = _pad2(w1, Dp, Ep).astype(compute_dtype)
    w2p = _pad2(w2, Ep, Dp).astype(compute_dtype)
    b1p = _pad2(jnp.reshape(b1, (1, -1)), 1, Ep).astype(jnp.float32)
    b2p = _pad2(jnp.reshape(b2, (1, -1)), 1, Dp).astype(jnp.float32)

    need = vmem_need_resident(tile_b) if resident else vmem_need_etiled(tile_b, tile_e)
    vmem_limit = min(max(int(1.25 * need), 16 * 1024 * 1024), hard_cap)

    cost = pl.CostEstimate(
        flops=4 * Bp * Dp * Ep,                  # two matmuls
        transcendentals=Bp * Ep,                 # sigmoid
        bytes_accessed=(Bp * Dp * (xbytes + obytes)
                        + 2 * Dp * Ep * cbytes + (Ep + Dp) * 4),
    )

    if resident:
        def _const_spec(shape, single):
            idx = lambda i: (0,) * len(shape)
            if single:
                return pl.BlockSpec(shape, idx, pipeline_mode=pl.Buffered(1))
            return pl.BlockSpec(shape, idx)

        def _build(single_buffer_weights):
            return pl.pallas_call(
                _ae_kernel_resident,
                out_shape=jax.ShapeDtypeStruct((Bp, Dp), out_dtype),
                grid_spec=pltpu.PrefetchScalarGridSpec(
                    num_scalar_prefetch=0,
                    grid=(Bp // tile_b,),
                    in_specs=[
                        pl.BlockSpec((tile_b, Dp), lambda i: (i, 0)),   # x tile (pipelined)
                        _const_spec((Dp, Ep), single_buffer_weights),   # W1 (resident)
                        _const_spec((1, Ep), single_buffer_weights),    # b1
                        _const_spec((Ep, Dp), single_buffer_weights),   # W2 (resident)
                        _const_spec((1, Dp), single_buffer_weights),    # b2
                    ],
                    out_specs=pl.BlockSpec((tile_b, Dp), lambda i: (i, 0)),
                ),
                compiler_params=pltpu.CompilerParams(
                    dimension_semantics=("parallel",),
                    vmem_limit_bytes=vmem_limit),
                cost_estimate=cost,
            )

        try:
            out = _build(True)(xin, w1p, b1p, w2p, b2p)
        except _RETRY_ERRORS:
            # Retry only when pl.Buffered(1) single-buffering is rejected by this jax build.
            out = _build(False)(xin, w1p, b1p, w2p, b2p)
    else:
        out = pl.pallas_call(
            _ae_kernel_etiled,
            out_shape=jax.ShapeDtypeStruct((Bp, Dp), out_dtype),
            grid_spec=pltpu.PrefetchScalarGridSpec(
                num_scalar_prefetch=0,
                grid=(Bp // tile_b, Ep // tile_e),
                in_specs=[
                    pl.BlockSpec((tile_b, Dp), lambda i, k: (i, 0)),    # x (constant over k)
                    pl.BlockSpec((Dp, tile_e), lambda i, k: (0, k)),    # W1 column tile
                    pl.BlockSpec((1, tile_e), lambda i, k: (0, k)),     # b1 tile
                    pl.BlockSpec((tile_e, Dp), lambda i, k: (k, 0)),    # W2 row tile
                    pl.BlockSpec((1, Dp), lambda i, k: (0, 0)),         # b2
                ],
                out_specs=pl.BlockSpec((tile_b, Dp), lambda i, k: (i, 0)),
                scratch_shapes=[pltpu.VMEM((tile_b, Dp), jnp.float32)],
            ),
            compiler_params=pltpu.CompilerParams(
                dimension_semantics=("parallel", "arbitrary"),
                vmem_limit_bytes=vmem_limit),
            cost_estimate=cost,
        )(xin, w1p, b1p, w2p, b2p)

    if need_pad:
        out = out[:B, :D]
    return out


def init_params(key, input_dim, encoding_dim, dtype=jnp.float32):
    """Deterministic init matching PyTorch nn.Linear's default U(-1/sqrt(fan_in), +)."""
    k1, k2, k3, k4 = jax.random.split(key, 4)
    lim1 = 1.0 / (input_dim ** 0.5)
    lim2 = 1.0 / (encoding_dim ** 0.5)
    # stored already transposed to (in, out) for the kernel
    w1 = jax.random.uniform(k1, (input_dim, encoding_dim), dtype, -lim1, lim1)
    b1 = jax.random.uniform(k2, (1, encoding_dim), dtype, -lim1, lim1)
    w2 = jax.random.uniform(k3, (encoding_dim, input_dim), dtype, -lim2, lim2)
    b2 = jax.random.uniform(k4, (1, input_dim), dtype, -lim2, lim2)
    return w1, b1, w2, b2


if __name__ == "__main__":
    key = jax.random.PRNGKey(0)
    kx1, kp1, kx2, kp2 = jax.random.split(key, 4)

    # --- primary (VMEM-resident weights) path -------------------------------------
    batch, input_dim, encoding_dim = 16, 64, 32
    x = jax.random.normal(kx1, (batch, input_dim), jnp.float32)
    w1, b1, w2, b2 = init_params(kp1, input_dim, encoding_dim)
    out = jax.block_until_ready(linear_autoencoder(x, w1, b1, w2, b2))
    ref = jax.nn.sigmoid(x @ w1 + b1) @ w2 + b2
    assert out.shape == (batch, input_dim)
    # tolerance relaxed because MXU inputs are bf16 (f32 accumulate)
    assert jnp.allclose(out, ref, atol=3e-2, rtol=3e-2), "resident path mismatch vs reference"

    # --- encoding-dim-tiled fallback path (used when weights overflow VMEM) -------
    batch2, input_dim2, encoding_dim2 = 16, 128, 256
    x2 = jax.random.normal(kx2, (batch2, input_dim2), jnp.float32)
    w1b, b1b, w2b, b2b = init_params(kp2, input_dim2, encoding_dim2)
    out2 = jax.block_until_ready(
        linear_autoencoder(x2, w1b, b1b, w2b, b2b, tile_e=128, force_etiled=True))
    ref2 = jax.nn.sigmoid(x2 @ w1b + b1b) @ w2b + b2b
    assert out2.shape == (batch2, input_dim2)
    assert jnp.allclose(out2, ref2, atol=3e-2, rtol=3e-2), "E-tiled path mismatch vs reference"

    print("KERNEL_OK")
</pallas_src>

<mosaic_0001>
module attributes {stable_mosaic.version = 11 : i64} {
  func.func @_ae_kernel_resident(%arg0: i32, %arg1: memref<16x128xf32, #tpu.memory_space<vmem>>, %arg2: memref<128x128xbf16, #tpu.memory_space<vmem>>, %arg3: memref<1x128xf32, #tpu.memory_space<vmem>>, %arg4: memref<128x128xbf16, #tpu.memory_space<vmem>>, %arg5: memref<1x128xf32, #tpu.memory_space<vmem>>, %arg6: memref<16x128xf32, #tpu.memory_space<vmem>>) attributes {dimension_semantics = [#tpu.dimension_semantics<parallel>], iteration_bounds = array<i64: 1>, scalar_prefetch = 0 : i64, scratch_operands = 0 : i64, tpu.core_type = #tpu.core_type<tc>, window_params = [{transform_indices = @transform_0, window_bounds = array<i64: 16, 128>}, {pipeline_mode = #tpu.pipeline_mode<synchronous>, transform_indices = @transform_1, window_bounds = array<i64: 128, 128>}, {pipeline_mode = #tpu.pipeline_mode<synchronous>, transform_indices = @transform_2, window_bounds = array<i64: 1, 128>}, {pipeline_mode = #tpu.pipeline_mode<synchronous>, transform_indices = @transform_3, window_bounds = array<i64: 128, 128>}, {pipeline_mode = #tpu.pipeline_mode<synchronous>, transform_indices = @transform_4, window_bounds = array<i64: 1, 128>}, {transform_indices = @transform_5, window_bounds = array<i64: 16, 128>}]} {
    %c0 = arith.constant 0 : index
    %c0_0 = arith.constant 0 : index
    %0 = vector.load %arg1[%c0, %c0_0] : memref<16x128xf32, #tpu.memory_space<vmem>>, vector<16x128xf32>
    %1 = arith.truncf %0 : vector<16x128xf32> to vector<16x128xbf16>
    %c0_1 = arith.constant 0 : index
    %c0_2 = arith.constant 0 : index
    %2 = vector.load %arg2[%c0_1, %c0_2] : memref<128x128xbf16, #tpu.memory_space<vmem>>, vector<128x128xbf16>
    %cst = arith.constant dense<0.000000e+00> : vector<16x128xf32>
    %3 = tpu.matmul %1, %2, %cst {dimension_numbers = #tpu.dot_dimension_numbers<[1], [0], [0], [1], [0, 0, 1, 1], [], []>} : vector<16x128xbf16>, vector<128x128xbf16>, vector<16x128xf32> -> vector<16x128xf32>
    %c0_3 = arith.constant 0 : index
    %c0_4 = arith.constant 0 : index
    %4 = vector.load %arg3[%c0_3, %c0_4] : memref<1x128xf32, #tpu.memory_space<vmem>>, vector<1x128xf32>
    %5 = vector.broadcast %4 : vector<1x128xf32> to vector<16x128xf32>
    %6 = arith.addf %3, %5 : vector<16x128xf32>
    %7 = arith.negf %6 : vector<16x128xf32>
    %8 = math.exp %7 : vector<16x128xf32>
    %cst_5 = arith.constant 1.000000e+00 : f32
    %9 = vector.broadcast %cst_5 : f32 to vector<16x128xf32>
    %10 = arith.addf %9, %8 : vector<16x128xf32>
    %11 = arith.divf %9, %10 : vector<16x128xf32>
    %12 = arith.truncf %11 : vector<16x128xf32> to vector<16x128xbf16>
    %c0_6 = arith.constant 0 : index
    %c0_7 = arith.constant 0 : index
    %13 = vector.load %arg4[%c0_6, %c0_7] : memref<128x128xbf16, #tpu.memory_space<vmem>>, vector<128x128xbf16>
    %cst_8 = arith.constant dense<0.000000e+00> : vector<16x128xf32>
    %14 = tpu.matmul %12, %13, %cst_8 {dimension_numbers = #tpu.dot_dimension_numbers<[1], [0], [0], [1], [0, 0, 1, 1], [], []>} : vector<16x128xbf16>, vector<128x128xbf16>, vector<16x128xf32> -> vector<16x128xf32>
    %c0_9 = arith.constant 0 : index
    %c0_10 = arith.constant 0 : index
    %15 = vector.load %arg5[%c0_9, %c0_10] : memref<1x128xf32, #tpu.memory_space<vmem>>, vector<1x128xf32>
    %16 = vector.broadcast %15 : vector<1x128xf32> to vector<16x128xf32>
    %17 = arith.addf %14, %16 : vector<16x128xf32>
    %c0_11 = arith.constant 0 : index
    %c0_12 = arith.constant 0 : index
    %18 = vector.load %arg6[%c0_11, %c0_12] : memref<16x128xf32, #tpu.memory_space<vmem>>, vector<16x128xf32>
    tpu.vector_store %arg6[%c0_11, %c0_12], %17 {strides = array<i32>} : memref<16x128xf32, #tpu.memory_space<vmem>>, vector<16x128xf32>,
    return
  }
  func.func @transform_0(%arg0: i32) -> (i32, i32) {
    %c0_i32 = arith.constant 0 : i32
    %c0_i32_0 = arith.constant 0 : i32
    return %arg0, %c0_i32 : i32, i32
  }
  func.func @transform_1(%arg0: i32) -> (i32, i32) {
    %c0_i32 = arith.constant 0 : i32
    %c0_i32_0 = arith.constant 0 : i32
    %c0_i32_1 = arith.constant 0 : i32
    return %c0_i32, %c0_i32_0 : i32, i32
  }
  func.func @transform_2(%arg0: i32) -> (i32, i32) {
    %c0_i32 = arith.constant 0 : i32
    %c0_i32_0 = arith.constant 0 : i32
    %c0_i32_1 = arith.constant 0 : i32
    return %c0_i32, %c0_i32_0 : i32, i32
  }
  func.func @transform_3(%arg0: i32) -> (i32, i32) {
    %c0_i32 = arith.constant 0 : i32
    %c0_i32_0 = arith.constant 0 : i32
    %c0_i32_1 = arith.constant 0 : i32
    return %c0_i32, %c0_i32_0 : i32, i32
  }
  func.func @transform_4(%arg0: i32) -> (i32, i32) {
    %c0_i32 = arith.constant 0 : i32
    %c0_i32_0 = arith.constant 0 : i32
    %c0_i32_1 = arith.constant 0 : i32
    return %c0_i32, %c0_i32_0 : i32, i32
  }
  func.func @transform_5(%arg0: i32) -> (i32, i32) {
    %c0_i32 = arith.constant 0 : i32
    %c0_i32_0 = arith.constant 0 : i32
    return %arg0, %c0_i32 : i32, i32
  }
}

</mosaic_0001>

<bundles_post_ra>
// kernel: tpu_custom_call.1
= control target key start
LH: loop header
LB: loop body
LE: loop exit
PB: predicated region body
PF: predicated region fallthrough
CT: control target
= control target key end

     0   :  { %10 = vsyncpa [#allocation3], 0  ;;  %s635_s0 = inlined_call_operand.hbm [shape: f32[16,128], index: 0, kind: input, shape index: {}]   ;;  %s636_s1 = inlined_call_operand.hbm [shape: bf16[128,128], index: 1, kind: input, shape index: {}]   ;;  %s637_s2 = inlined_call_operand.vmem [shape: f32[1,128], index: 2, kind: input, shape index: {}]   ;;  %s638_s3 = inlined_call_operand.hbm [shape: bf16[128,128], index: 3, kind: input, shape index: {}]   ;;  %s639_s4 = inlined_call_operand.vmem [shape: f32[1,128], index: 4, kind: input, shape index: {}]   ;;  %s640_s5 = inlined_call_operand.hbm [shape: f32[16,128], index: 5, kind: output, shape index: {}]  }
   0x1   :  { %11 = vsyncpa [#allocation6], 0 }
   0x2   :  { %12 = vsyncpa [#allocation4], 0  ;;  %s529_s18 = smov [#allocation5]   ;;  %s435_s22 = scalar_lea.hbm %s636_s1, 1024 }
   0x3   :  { %s30_s19 = sshll.u32 %s529_s18, 4  ;;  %p436_p0 = scmp.ne.s32.totalorder %s636_s1, %s435_s22  ;;  %s31_s19 = int_to_ptr.vmem [resolvable:$true] %s30_s19 }
   0x4   :  { %p439_p1 = scmp.lt.u32.totalorder %s435_s22, %s636_s1 }
   0x6   :  { %p441_p2 = pnand %p439_p1, %p436_p0 }
   0x8   :  { %444 = shalt.err (!%p441_p2)
}
   0x9   :  { %s445_s27 = scalar_lea.vmem %s31_s19, 1024  ;;  %p450_p4 = scmp.lt.s32.totalorder %s31_s19, %s31_s19 }
   0xa   :  { %p446_p3 = scmp.ne.s32.totalorder %s31_s19, %s445_s27  ;;  %p451_p5 = scmp.lt.s32.totalorder %s445_s27, %s445_s27 }
   0xc   :  { %p452_p6 = por %p451_p5, %p450_p4 }
   0xe   :  { %p453_p7 = pnand %p452_p6, %p446_p3 }
  0x10   :  { %456 = shalt.err (!%p453_p7)
}
  0x11   :  { %s530_s28 = smov 64   ;;  %s531_s29 = smov 4  }
  0x12   :  { %36 = dma.hbm_to_vmem [thread:$0]  %s636_s1, 1024, %s31_s19, [#allocation6], %s530_s28, %s530_s28, %s531_s29  }
  0x13   :  { %s532_s7 = smov [#allocation2]   ;;  %s457_s11 = scalar_lea.hbm %s635_s0, 256 }
  0x14   :  { %s18_s8 = sshll.u32 %s532_s7, 4  ;;  %p458_p8 = scmp.ne.s32.totalorder %s635_s0, %s457_s11  ;;  %s19_s8 = int_to_ptr.vmem [resolvable:$true] %s18_s8 }
  0x15   :  { %p461_p9 = scmp.lt.u32.totalorder %s457_s11, %s635_s0 }
  0x17   :  { %p463_p10 = pnand %p461_p9, %p458_p8 }
  0x19   :  { %466 = shalt.err (!%p463_p10)
}
  0x1a   :  { %s467_s16 = scalar_lea.vmem %s19_s8, 256  ;;  %p472_p12 = scmp.lt.s32.totalorder %s19_s8, %s19_s8 }
  0x1b   :  { %p468_p11 = scmp.ne.s32.totalorder %s19_s8, %s467_s16  ;;  %p473_p13 = scmp.lt.s32.totalorder %s467_s16, %s467_s16 }
  0x1d   :  { %p474_p0 = por %p473_p13, %p472_p12 }
  0x1f   :  { %p475_p1 = pnand %p474_p0, %p468_p11 }
  0x21   :  { %478 = shalt.err (!%p475_p1)
}
  0x22   :  { %s533_s1 = smov 128   ;;  %s534_s17 = smov 8  }
  0x23   :  { %24 = dma.hbm_to_vmem [thread:$0]  %s635_s0, 256, %s19_s8, [#allocation3], %s533_s1, %s533_s1, %s534_s17  }
  0x24   :  { %s535_s20 = smov [#allocation7]   ;;  %s479_s24 = scalar_lea.hbm %s638_s3, 1024 }
  0x25   :  { %s44_s21 = sshll.u32 %s535_s20, 4  ;;  %p480_p2 = scmp.ne.s32.totalorder %s638_s3, %s479_s24  ;;  %s45_s21 = int_to_ptr.vmem [resolvable:$true] %s44_s21 }
  0x26   :  { %p483_p3 = scmp.lt.u32.totalorder %s479_s24, %s638_s3 }
  0x28   :  { %p485_p4 = pnand %p483_p3, %p480_p2 }
  0x2a   :  { %488 = shalt.err (!%p485_p4)
}
  0x2b   :  { %s489_s6 = scalar_lea.vmem %s45_s21, 1024  ;;  %p494_p6 = scmp.lt.s32.totalorder %s45_s21, %s45_s21 }
  0x2c   :  { %p490_p5 = scmp.ne.s32.totalorder %s45_s21, %s489_s6  ;;  %p495_p7 = scmp.lt.s32.totalorder %s489_s6, %s489_s6 }
  0x2e   :  { %p496_p8 = por %p495_p7, %p494_p6 }
  0x30   :  { %p497_p9 = pnand %p496_p8, %p490_p5 }
  0x32   :  { %500 = shalt.err (!%p497_p9)
}
  0x33   :  { %50 = dma.hbm_to_vmem [thread:$0]  %s638_s3, 1024, %s45_s21, [#allocation6], %s530_s28, %s530_s28, %s531_s29  }
  0x34   :  { %523 = dma.done.wait [#allocation3], 256  }
  0x35   :  { %524 = vsyncadd [#allocation3], 4294967040 }
  0x36   :  { %525 = dma.done.wait [#allocation6], 2048  }
  0x37   :  { %526 = vsyncadd [#allocation6], 4294965248  ;;  %v536_v0 = vmov 0.0   ;;  %vm537_vm0 = vmmov 0   ;;  %v411_v1 = vld [vmem:[#allocation5] sm:$0xff]   ;;  %v412_v2 = vld [vmem:[#allocation5 + $0x8] sm:$0xff]  }
  0x38   :  { %361 = vmatprep.subr.bf16.mxu0 %v536_v0  ;;  %377 = vmatprep.mubr.msk.bf16.mxu0 %vm537_vm0, %v536_v0  ;;  %v413_v3 = vld [vmem:[#allocation5 + $0x10] sm:$0xff]   ;;  %v414_v4 = vld [vmem:[#allocation5 + $0x18] sm:$0xff]   ;;  %v415_v5 = vld [vmem:[#allocation5 + $0x20] sm:$0xff]   ;;  %s538_s8 = smov [#allocation8]  }
  0x39   :  { %381 = vmatprep.subr.bf16.mxu1 %v536_v0  ;;  %397 = vmatprep.mubr.msk.bf16.mxu1 %vm537_vm0, %v536_v0  ;;  %v416_v6 = vld [vmem:[#allocation5 + $0x28] sm:$0xff]   ;;  %v417_v7 = vld [vmem:[#allocation5 + $0x30] sm:$0xff]   ;;  %v418_v8 = vld [vmem:[#allocation5 + $0x38] sm:$0xff]   ;;  %s310_s9 = sshll.u32 %s538_s8, 4  ;;  %s311_s9 = int_to_ptr.vmem [resolvable:$true] %s310_s9 }
  0x3a   :  { %362 = vmatpush3.bf16.msra.mxu0 %v411_v1  ;;  %v63_v9 = vld [vmem:[#allocation2] sm:$0xff]  ;;  %v64_v10 = vld [vmem:[#allocation2 + $0x8] sm:$0xff]  ;;  %v419_v12 = vld [vmem:[#allocation7] sm:$0xff]   ;;  %s501_s10 = scalar_lea.vmem %s311_s9, 256  ;;  %p506_p11 = scmp.lt.s32.totalorder %s311_s9, %s311_s9 }
  0x3b   :  { %363 = vmatprep.subr.bf16.mxu0 %v536_v0  ;;  %v65_v11 = vpack.c.bf16 %v64_v10, %v63_v9  ;;  %382 = vmatpush3.bf16.msra.mxu1 %v419_v12  ;;  %v420_v13 = vld [vmem:[#allocation7 + $0x8] sm:$0xff]   ;;  %v421_v14 = vld [vmem:[#allocation7 + $0x10] sm:$0xff]   ;;  %v422_v15 = vld [vmem:[#allocation7 + $0x18] sm:$0xff]   ;;  %p502_p10 = scmp.ne.s32.totalorder %s311_s9, %s501_s10  ;;  %p507_p12 = scmp.lt.s32.totalorder %s501_s10, %s501_s10 }
  0x3c   :  { %383 = vmatprep.subr.bf16.mxu1 %v536_v0  ;;  %v423_v16 = vld [vmem:[#allocation7 + $0x20] sm:$0xff]   ;;  %v424_v17 = vld [vmem:[#allocation7 + $0x28] sm:$0xff]   ;;  %v425_v18 = vld [vmem:[#allocation7 + $0x30] sm:$0xff]  }
  0x3d   :  { %v426_v19 = vld [vmem:[#allocation7 + $0x38] sm:$0xff]   ;;  %v323_v20 = vld [vmem:[%s637_s2] ss:$0 sm:$0xff]  ;;  %p508_p13 = por %p507_p12, %p506_p11 }
  0x3e   :  { %364 = vmatpush3.bf16.msra.mxu0 %v412_v2  ;;  %v334_v36 = vld [vmem:[%s639_s4] ss:$0 sm:$0xff] }
  0x3f   :  { %365 = vmatprep.subr.bf16.mxu0 %v536_v0  ;;  %384 = vmatpush3.bf16.msra.mxu1 %v420_v13  ;;  %p509_p0 = pnand %p508_p13, %p502_p10 }
  0x40   :  { %385 = vmatprep.subr.bf16.mxu1 %v536_v0 }
  0x42   :  { %366 = vmatpush3.bf16.msra.mxu0 %v413_v3 }
  0x43   :  { %367 = vmatprep.subr.bf16.mxu0 %v536_v0  ;;  %386 = vmatpush3.bf16.msra.mxu1 %v421_v14 }
  0x44   :  { %387 = vmatprep.subr.bf16.mxu1 %v536_v0 }
  0x46   :  { %368 = vmatpush3.bf16.msra.mxu0 %v414_v4 }
  0x47   :  { %369 = vmatprep.subr.bf16.mxu0 %v536_v0  ;;  %388 = vmatpush3.bf16.msra.mxu1 %v422_v15 }
  0x48   :  { %389 = vmatprep.subr.bf16.mxu1 %v536_v0 }
  0x4a   :  { %370 = vmatpush3.bf16.msra.mxu0 %v415_v5 }
  0x4b   :  { %371 = vmatprep.subr.bf16.mxu0 %v536_v0  ;;  %390 = vmatpush3.bf16.msra.mxu1 %v423_v16 }
  0x4c   :  { %391 = vmatprep.subr.bf16.mxu1 %v536_v0 }
  0x4e   :  { %372 = vmatpush3.bf16.msra.mxu0 %v416_v6 }
  0x4f   :  { %373 = vmatprep.subr.bf16.mxu0 %v536_v0  ;;  %392 = vmatpush3.bf16.msra.mxu1 %v424_v17 }
  0x50   :  { %393 = vmatprep.subr.bf16.mxu1 %v536_v0 }
  0x52   :  { %374 = vmatpush3.bf16.msra.mxu0 %v417_v7 }
  0x53   :  { %375 = vmatprep.subr.bf16.mxu0 %v536_v0  ;;  %394 = vmatpush3.bf16.msra.mxu1 %v425_v18 }
  0x54   :  { %395 = vmatprep.subr.bf16.mxu1 %v536_v0 }
  0x56   :  { %376 = vmatpush3.bf16.msra.mxu0 %v418_v8 }
  0x57   :  { %396 = vmatpush3.bf16.msra.mxu1 %v426_v19 }
  0x59   :  { %378 = vmatmul.mubr.bf16.vlgmr.msra.gmra.mrb[0].mxu0 %v65_v11 }
 0x12c   :  { %v171_v21 = vpop.f32.mrb[0].mxu0 }
 0x12d   :  { %v172_v22 = vadd.f32 %v323_v20, %v171_v21  ;;  %v379_v23 = vpop.f32.mrb[1].mxu0 }
 0x12e   :  { %v174_v24 = vpop.f32.mrb[2].mxu0 }
 0x12f   :  { %v332_v25 = vmul.f32 -1.442695, %v172_v22  ;;  %v175_v26 = vadd.f32 %v323_v20, %v174_v24  ;;  %v380_v27 = vpop.f32.mrb[3].mxu0 }
 0x131   :  { %427 = vpow2.f32 %v332_v25  ;;  %v333_v28 = vmul.f32 -1.442695, %v175_v26 }
 0x133   :  { %429 = vpow2.f32 %v333_v28 }
 0x13b   :  { %v428_v29 = vpop.eup %427 }
 0x13c   :  { %v184_v30 = vadd.f32 1.0, %v428_v29 }
 0x13d   :  { %v430_v31 = vpop.eup %429 }
 0x13e   :  { %v185_v32 = vadd.f32 1.0, %v430_v31  ;;  %431 = vrcp.f32 %v184_v30 }
 0x140   :  { %433 = vrcp.f32 %v185_v32 }
 0x148   :  { %v432_v33 = vpop.eup %431 }
 0x14a   :  { %v434_v34 = vpop.eup %433 }
 0x14b   :  { %v190_v35 = vpack.c.bf16 %v434_v34, %v432_v33 }
 0x14d   :  { %398 = vmatmul.mubr.bf16.vlgmr.msra.gmra.mrb[0].mxu1 %v190_v35 }
 0x220   :  { %v296_v37 = vpop.f32.mrb[0].mxu1 }
 0x221   :  { %v297_v38 = vadd.f32 %v334_v36, %v296_v37  ;;  %v399_v39 = vpop.f32.mrb[1].mxu1 }
 0x222   :  { %v299_v40 = vpop.f32.mrb[2].mxu1 }
 0x223   :  { %303 = vst [vmem:[#allocation8] sm:$0xff] %v297_v38  ;;  %v300_v41 = vadd.f32 %v334_v36, %v299_v40  ;;  %v400_v42 = vpop.f32.mrb[3].mxu1 }
 0x225   :  { %304 = vst [vmem:[#allocation8 + $0x8] sm:$0xff] %v300_v41 }
 0x226   :  { %512 = shalt.err (!%p509_p0)
}
 0x227   :  { %s513_s12 = scalar_lea.hbm %s640_s5, 256 }
 0x228   :  { %p514_p1 = scmp.ne.s32.totalorder %s640_s5, %s513_s12  ;;  %p517_p2 = scmp.lt.u32.totalorder %s513_s12, %s640_s5 }
 0x22a   :  { %p519_p3 = pnand %p517_p2, %p514_p1 }
 0x22c   :  { %522 = shalt.err (!%p519_p3)
}
 0x22d   :  { %316 = dma.vmem_to_hbm [thread:$0]  %s311_s9, 256, %s640_s5, [#allocation4], %s533_s1, %s533_s1, %s534_s17  }
 0x22e   :  { %527 = dma.done.wait [#allocation4], 256  }
 0x22f   :  { %528 = vsyncadd [#allocation4], 4294967040 }
 0x230   :  { %320 = vsyncpa [#allocation3], 1 }
 0x231   :  { %321 = vsyncpa [#allocation6], 1 }
 0x232   :  { %322 = vsyncpa [#allocation4], 1 }

</bundles_post_ra>
